<compile_context>
chip_gen: v6e
topology: v6e:2x2x1
jax: 0.10.0
libtpu: 0.0.40
codegen_flags: <defaults>
</compile_context>

<pallas_src>
import numpy as np
import jax
import jax.numpy as jnp
from jax.experimental import pallas as pl
from jax.experimental.pallas import tpu as pltpu

# ---------------- configuration (small, consistent with the module) ----------------
B = 4            # batch of images / input texts ; topK = B - 1
C = 4            # in_channels
HW = 16          # input_size (== ClipNet.max_stride())
SEQ = 8          # token sequence length (fixed length; no pad-token masking)
VOCAB = 32       # synthetic vocab
EMB = 64         # token embedding width
HIDDEN = 128     # image-encoder hidden width
DFEAT = 128      # num_features (module uses 512; if widened, tile N at 256 on v6e/v7x, 128 on v5e)
M_OTHER = 6      # hard-negative texts per image (other_texts.shape[1])

B_PAD = 8                    # sublane-pad the image batch
GROUP = 8                    # text rows per image: [positive, M negatives, pad]
N_TXT_PAD = 128              # lane-pad total text rows -> dense (8, 128) logits slab (unmasked vst)
N_TXT_VALID = B * GROUP
XDIM = C * HW * HW           # 1024 flattened image features
EPS = 1e-12                  # avoids NaN on zero-norm (padded) rows


# ---------------------------- fused Pallas kernel ----------------------------
def clipnet_fused_kernel(scale_ref, x_ref, tok_ref, w1_ref, b1_ref, w2_ref, b2_ref,
                         wtxt_ref, bt_ref, o_ref):
    """One fused forward step.

    scale_ref: SMEM (1,) f32          exp(logit_scale)
    x_ref:     VMEM (8, 1024) bf16    flattened NCHW images (rows >= B are zero padding)
    tok_ref:   VMEM (8, 128) i32      token ids, text rows on the LANE axis (lane-dense)
    w1/w2/wtxt: bf16 MXU weights; b1/b2/bt f32 biases (bt as a (D,1) column)
    o_ref:     VMEM (8, 128) f32      scaled cosine logits: o[i, 8*i + k] = image i vs text slot k
    """
    # ---- image encoder stand-in: linear -> ReLU -> linear (bf16 MXU operands, f32 accum) ----
    h = jnp.dot(x_ref[...], w1_ref[...], preferred_element_type=jnp.float32) + b1_ref[...]
    h = jnp.maximum(h, 0.0)
    img = jnp.dot(h.astype(jnp.bfloat16), w2_ref[...],
                  preferred_element_type=jnp.float32) + b2_ref[...]                   # (8, D)

    # ---- text encoder stand-in: bag-of-words counts, lane-dense (VOCAB, 128) ----
    # embed + mean-pool + linear fused into ONE matmul: txt = W_txt^T @ counts,
    # with W_txt = (emb_table @ wt) / SEQ precomputed outside the kernel.
    tok = tok_ref[...]                                                                 # (SEQ, 128)
    vocab_ids = jax.lax.broadcasted_iota(jnp.int32, (VOCAB, N_TXT_PAD), 0)             # (32, 128)
    counts = jnp.zeros((VOCAB, N_TXT_PAD), jnp.float32)
    for s in range(SEQ):  # static unroll; lane-dense VPU compares, no gather needed
        counts = counts + (tok[s:s + 1, :] == vocab_ids).astype(jnp.float32)
    # TODO(synk): mean-pool assumes fixed-length sequences (no pad-token mask), as in the stand-in.
    txt = jnp.dot(wtxt_ref[...], counts.astype(jnp.bfloat16),
                  preferred_element_type=jnp.float32) + bt_ref[...]                    # (D, 128)

    # ---- CLIP head (f32): rsqrt L2-normalize (EUP), mask pad text columns, cosine on MXU ----
    col = jax.lax.broadcasted_iota(jnp.int32, (1, N_TXT_PAD), 1)
    valid = ((col < N_TXT_VALID) & ((col & (GROUP - 1)) <= M_OTHER)).astype(jnp.float32)
    txt_n = txt * (valid * jax.lax.rsqrt(jnp.sum(txt * txt, axis=0, keepdims=True) + EPS))
    # logit scale folded into the image normalization factor (no separate tail multiply)
    img_n = img * (scale_ref[0] *
                   jax.lax.rsqrt(jnp.sum(img * img, axis=-1, keepdims=True) + EPS))
    # txt is already (D, N): plain (8,D)@(D,128) matmul, no transpose on the critical tail
    o_ref[...] = jnp.dot(img_n, txt_n, preferred_element_type=jnp.float32)


def _fused_logits(scale, x_steps, tok_steps, kp):
    """Grid over a leading micro-batch axis; weights stay VMEM-resident across steps
    (constant index_maps), per-step image/token/output blocks are pipelined."""
    n_steps = x_steps.shape[0]
    const2 = lambda s: (0, 0)
    return pl.pallas_call(
        clipnet_fused_kernel,
        out_shape=jax.ShapeDtypeStruct((n_steps, B_PAD, N_TXT_PAD), jnp.float32),
        grid=(n_steps,),
        in_specs=[
            pl.BlockSpec(memory_space=pltpu.MemorySpace.SMEM),                     # exp(logit_scale)
            pl.BlockSpec((None, B_PAD, XDIM), lambda s: (s, 0, 0)),                # images (per step)
            pl.BlockSpec((None, SEQ, N_TXT_PAD), lambda s: (s, 0, 0)),             # tokens (per step)
            pl.BlockSpec((XDIM, HIDDEN), const2),                                  # w1   (resident)
            pl.BlockSpec((1, HIDDEN), const2),                                     # b1
            pl.BlockSpec((HIDDEN, DFEAT), const2),                                 # w2   (resident)
            pl.BlockSpec((1, DFEAT), const2),                                      # b2
            pl.BlockSpec((DFEAT, VOCAB), const2),                                  # fused text W^T
            pl.BlockSpec((DFEAT, 1), const2),                                      # bt (column)
        ],
        out_specs=pl.BlockSpec((None, B_PAD, N_TXT_PAD), lambda s: (s, 0, 0)),
        compiler_params=pltpu.CompilerParams(
            dimension_semantics=("parallel",)),   # lets v7x split steps across its 2 TensorCores
    )(scale, x_steps, tok_steps,
      kp["w1"], kp["b1"], kp["w2"], kp["b2"], kp["w_txt_t"], kp["bt_col"])


# ---------------------------- full forward ----------------------------
def clipnet_forward(kparams, input_images, input_texts, other_texts):
    """ClipNet.forward (output_loss=False path): returns (B, B) logits_per_image."""
    b = input_images.shape[0]
    m = other_texts.shape[1]
    topK = b - 1

    # Flatten NCHW image, cast to bf16 (MXU operand, halves input DMA), pad batch to 8 sublanes.
    x_flat = input_images.reshape(b, -1).astype(jnp.bfloat16)
    x_pad = jnp.pad(x_flat, ((0, B_PAD - b), (0, 0)))[None]                       # (1, 8, 1024)

    # Group texts per image: slot 0 = matching text, slots 1..m = hard negatives, rest pad.
    tok_group = jnp.concatenate([input_texts[:, None, :], other_texts], axis=1)   # (b, 1+m, SEQ)
    tok_group = jnp.pad(tok_group, ((0, 0), (0, GROUP - (1 + m)), (0, 0)))        # (b, 8, SEQ)
    tok_rows = jnp.pad(tok_group.reshape(b * GROUP, SEQ),
                       ((0, N_TXT_PAD - b * GROUP), (0, 0)))                      # (128, SEQ)
    tok_t = tok_rows.T[None]                                                      # (1, SEQ, 128)

    scale = jnp.exp(kparams["logit_scale"]).reshape(1)                            # logit_scale.exp()

    logits_full = _fused_logits(scale, x_pad, tok_t, kparams)[0]                  # (8, 128)

    # ---- torch-style per-image topK assembly (tiny; kept as XLA glue) ----
    # TODO(synk): torch.sort / topK row gather has no clean in-kernel Pallas equivalent;
    #             could become a 6-element sorting network in the kernel tail later.
    block = logits_full[:b, :b * GROUP].reshape(b, b, GROUP)
    eye = jnp.eye(b, dtype=logits_full.dtype)
    per_image = jnp.sum(block * eye[:, :, None], axis=1)                          # static-mask select
    pos = per_image[:, 0]                                                         # (b,)
    neg = per_image[:, 1:1 + m]                                                   # (b, m)
    neg_sorted = -jnp.sort(-neg, axis=1)                                          # descending
    topk = neg_sorted[:, :topK]                                                   # (b, topK)

    # torch: indices = sorted(range(topK) + [min(i, topK-1)]); row[:, i] = positive logit
    idx_rows = np.stack(
        [np.sort(np.array(list(range(topK)) + [min(i, topK - 1)], np.int64)) for i in range(b)],
        axis=0)                                                                   # static (b, b)
    sel = np.zeros((b, topK, b), np.float32)
    sel[np.arange(b)[:, None], idx_rows, np.arange(b)[None, :]] = 1.0             # static one-hot gather
    gathered = jnp.einsum("ik,ikj->ij", topk, jnp.asarray(sel))                   # (b, b)
    logits_per_image = jnp.where(jnp.eye(b, dtype=bool), pos[:, None], gathered)
    return logits_per_image


# ---------------------------- deterministic params / inputs ----------------------------
def make_params():
    """Module-style f32 parameters (synthetic stand-ins for TextEncoder / BasicNet)."""
    ks = jax.random.split(jax.random.PRNGKey(0), 8)
    return {
        "w1": 0.02 * jax.random.normal(ks[0], (XDIM, HIDDEN), jnp.float32),
        "b1": 0.01 * jax.random.normal(ks[1], (1, HIDDEN), jnp.float32),
        "w2": 0.02 * jax.random.normal(ks[2], (HIDDEN, DFEAT), jnp.float32),
        "b2": 0.01 * jax.random.normal(ks[3], (1, DFEAT), jnp.float32),
        "emb_table": 0.02 * jax.random.normal(ks[4], (VOCAB, EMB), jnp.float32),
        "wt": 0.02 * jax.random.normal(ks[5], (EMB, DFEAT), jnp.float32),
        "bt": 0.01 * jax.random.normal(ks[6], (1, DFEAT), jnp.float32),
        "logit_scale": jnp.asarray(np.log(1.0 / 0.07), jnp.float32),
    }


def prepare_kernel_params(p):
    """Kernel-ready params: bf16 MXU weights, text projection algebraically fused
    (W_txt = emb_table @ wt / SEQ) and pre-transposed to (DFEAT, VOCAB)."""
    w_txt = jnp.dot(p["emb_table"], p["wt"]) * (1.0 / SEQ)            # (VOCAB, DFEAT) f32
    return {
        "w1": p["w1"].astype(jnp.bfloat16),
        "b1": p["b1"],
        "w2": p["w2"].astype(jnp.bfloat16),
        "b2": p["b2"],
        "w_txt_t": w_txt.T.astype(jnp.bfloat16),                      # (DFEAT, VOCAB)
        "bt_col": p["bt"].reshape(DFEAT, 1),
        "logit_scale": p["logit_scale"],
    }


if __name__ == "__main__":
    params = make_params()
    kparams = prepare_kernel_params(params)

    key = jax.random.PRNGKey(0)
    k_img, k_txt, k_oth = jax.random.split(key, 3)
    input_images = jax.random.normal(k_img, (B, C, HW, HW), jnp.float32)           # NCHW
    input_texts = jax.random.randint(k_txt, (B, SEQ), 0, VOCAB, jnp.int32)
    other_texts = jax.random.randint(k_oth, (B, M_OTHER, SEQ), 0, VOCAB, jnp.int32)

    fwd = jax.jit(clipnet_forward)
    logits = jax.block_until_ready(fwd(kparams, input_images, input_texts, other_texts))

    assert logits.shape == (B, B), logits.shape
    assert bool(jnp.all(jnp.isfinite(logits)))
    print("KERNEL_OK")
</pallas_src>

<mosaic_0001>
module attributes {stable_mosaic.version = 11 : i64} {
  func.func @clipnet_fused_kernel(%arg0: i32, %arg1: memref<1xf32, #tpu.memory_space<smem>>, %arg2: memref<1x8x1024xbf16, #tpu.memory_space<vmem>>, %arg3: memref<1x8x128xi32, #tpu.memory_space<vmem>>, %arg4: memref<1024x128xbf16, #tpu.memory_space<vmem>>, %arg5: memref<1x128xf32, #tpu.memory_space<vmem>>, %arg6: memref<128x128xbf16, #tpu.memory_space<vmem>>, %arg7: memref<1x128xf32, #tpu.memory_space<vmem>>, %arg8: memref<128x32xbf16, #tpu.memory_space<vmem>>, %arg9: memref<128x1xf32, #tpu.memory_space<vmem>>, %arg10: memref<1x8x128xf32, #tpu.memory_space<vmem>>) attributes {dimension_semantics = [#tpu.dimension_semantics<parallel>], iteration_bounds = array<i64: 1>, scalar_prefetch = 0 : i64, scratch_operands = 0 : i64, tpu.core_type = #tpu.core_type<tc>, window_params = [{transform_indices = @transform_0, window_bounds = array<i64: 1>}, {transform_indices = @transform_1, window_bounds = array<i64: 1, 8, 1024>}, {transform_indices = @transform_2, window_bounds = array<i64: 1, 8, 128>}, {pipeline_mode = #tpu.pipeline_mode<synchronous>, transform_indices = @transform_3, window_bounds = array<i64: 1024, 128>}, {pipeline_mode = #tpu.pipeline_mode<synchronous>, transform_indices = @transform_4, window_bounds = array<i64: 1, 128>}, {pipeline_mode = #tpu.pipeline_mode<synchronous>, transform_indices = @transform_5, window_bounds = array<i64: 128, 128>}, {pipeline_mode = #tpu.pipeline_mode<synchronous>, transform_indices = @transform_6, window_bounds = array<i64: 1, 128>}, {pipeline_mode = #tpu.pipeline_mode<synchronous>, transform_indices = @transform_7, window_bounds = array<i64: 128, 32>}, {pipeline_mode = #tpu.pipeline_mode<synchronous>, transform_indices = @transform_8, window_bounds = array<i64: 128, 1>}, {transform_indices = @transform_9, window_bounds = array<i64: 1, 8, 128>}]} {
    %c0 = arith.constant 0 : index
    %c0_0 = arith.constant 0 : index
    %c0_1 = arith.constant 0 : index
    %0 = vector.load %arg2[%c0, %c0_0, %c0_1] : memref<1x8x1024xbf16, #tpu.memory_space<vmem>>, vector<1x8x1024xbf16>
    %1 = vector.shape_cast %0 : vector<1x8x1024xbf16> to vector<8x1024xbf16>
    %c0_2 = arith.constant 0 : index
    %c0_3 = arith.constant 0 : index
    %2 = vector.load %arg4[%c0_2, %c0_3] : memref<1024x128xbf16, #tpu.memory_space<vmem>>, vector<1024x128xbf16>
    %cst = arith.constant dense<0.000000e+00> : vector<8x128xf32>
    %3 = tpu.matmul %1, %2, %cst {dimension_numbers = #tpu.dot_dimension_numbers<[1], [0], [0], [1], [0, 0, 1, 1], [], []>} : vector<8x1024xbf16>, vector<1024x128xbf16>, vector<8x128xf32> -> vector<8x128xf32>
    %c0_4 = arith.constant 0 : index
    %c0_5 = arith.constant 0 : index
    %4 = vector.load %arg5[%c0_4, %c0_5] : memref<1x128xf32, #tpu.memory_space<vmem>>, vector<1x128xf32>
    %5 = vector.broadcast %4 : vector<1x128xf32> to vector<8x128xf32>
    %6 = arith.addf %3, %5 : vector<8x128xf32>
    %cst_6 = arith.constant 0.000000e+00 : f32
    %7 = vector.broadcast %cst_6 : f32 to vector<8x128xf32>
    %8 = arith.maximumf %6, %7 : vector<8x128xf32>
    %9 = arith.truncf %8 : vector<8x128xf32> to vector<8x128xbf16>
    %c0_7 = arith.constant 0 : index
    %c0_8 = arith.constant 0 : index
    %10 = vector.load %arg6[%c0_7, %c0_8] : memref<128x128xbf16, #tpu.memory_space<vmem>>, vector<128x128xbf16>
    %cst_9 = arith.constant dense<0.000000e+00> : vector<8x128xf32>
    %11 = tpu.matmul %9, %10, %cst_9 {dimension_numbers = #tpu.dot_dimension_numbers<[1], [0], [0], [1], [0, 0, 1, 1], [], []>} : vector<8x128xbf16>, vector<128x128xbf16>, vector<8x128xf32> -> vector<8x128xf32>
    %c0_10 = arith.constant 0 : index
    %c0_11 = arith.constant 0 : index
    %12 = vector.load %arg7[%c0_10, %c0_11] : memref<1x128xf32, #tpu.memory_space<vmem>>, vector<1x128xf32>
    %13 = vector.broadcast %12 : vector<1x128xf32> to vector<8x128xf32>
    %14 = arith.addf %11, %13 : vector<8x128xf32>
    %c0_12 = arith.constant 0 : index
    %c0_13 = arith.constant 0 : index
    %c0_14 = arith.constant 0 : index
    %15 = vector.load %arg3[%c0_12, %c0_13, %c0_14] : memref<1x8x128xi32, #tpu.memory_space<vmem>>, vector<1x8x128xi32>
    %16 = vector.shape_cast %15 : vector<1x8x128xi32> to vector<8x128xi32>
    %17 = tpu.iota {dimensions = array<i32: 0>} : vector<32x128xi32>
    %cst_15 = arith.constant 0.000000e+00 : f32
    %18 = vector.broadcast %cst_15 : f32 to vector<32x128xf32>
    %19 = vector.extract_strided_slice %16 {offsets = [0, 0], sizes = [1, 128], strides = [1, 1]} : vector<8x128xi32> to vector<1x128xi32>
    %20 = vector.broadcast %19 : vector<1x128xi32> to vector<32x128xi32>
    %21 = arith.cmpi eq, %20, %17 : vector<32x128xi32>
    %22 = arith.extui %21 : vector<32x128xi1> to vector<32x128xi32>
    %23 = arith.sitofp %22 : vector<32x128xi32> to vector<32x128xf32>
    %24 = arith.addf %18, %23 : vector<32x128xf32>
    %25 = vector.extract_strided_slice %16 {offsets = [1, 0], sizes = [1, 128], strides = [1, 1]} : vector<8x128xi32> to vector<1x128xi32>
    %26 = vector.broadcast %25 : vector<1x128xi32> to vector<32x128xi32>
    %27 = arith.cmpi eq, %26, %17 : vector<32x128xi32>
    %28 = arith.extui %27 : vector<32x128xi1> to vector<32x128xi32>
    %29 = arith.sitofp %28 : vector<32x128xi32> to vector<32x128xf32>
    %30 = arith.addf %24, %29 : vector<32x128xf32>
    %31 = vector.extract_strided_slice %16 {offsets = [2, 0], sizes = [1, 128], strides = [1, 1]} : vector<8x128xi32> to vector<1x128xi32>
    %32 = vector.broadcast %31 : vector<1x128xi32> to vector<32x128xi32>
    %33 = arith.cmpi eq, %32, %17 : vector<32x128xi32>
    %34 = arith.extui %33 : vector<32x128xi1> to vector<32x128xi32>
    %35 = arith.sitofp %34 : vector<32x128xi32> to vector<32x128xf32>
    %36 = arith.addf %30, %35 : vector<32x128xf32>
    %37 = vector.extract_strided_slice %16 {offsets = [3, 0], sizes = [1, 128], strides = [1, 1]} : vector<8x128xi32> to vector<1x128xi32>
    %38 = vector.broadcast %37 : vector<1x128xi32> to vector<32x128xi32>
    %39 = arith.cmpi eq, %38, %17 : vector<32x128xi32>
    %40 = arith.extui %39 : vector<32x128xi1> to vector<32x128xi32>
    %41 = arith.sitofp %40 : vector<32x128xi32> to vector<32x128xf32>
    %42 = arith.addf %36, %41 : vector<32x128xf32>
    %43 = vector.extract_strided_slice %16 {offsets = [4, 0], sizes = [1, 128], strides = [1, 1]} : vector<8x128xi32> to vector<1x128xi32>
    %44 = vector.broadcast %43 : vector<1x128xi32> to vector<32x128xi32>
    %45 = arith.cmpi eq, %44, %17 : vector<32x128xi32>
    %46 = arith.extui %45 : vector<32x128xi1> to vector<32x128xi32>
    %47 = arith.sitofp %46 : vector<32x128xi32> to vector<32x128xf32>
    %48 = arith.addf %42, %47 : vector<32x128xf32>
    %49 = vector.extract_strided_slice %16 {offsets = [5, 0], sizes = [1, 128], strides = [1, 1]} : vector<8x128xi32> to vector<1x128xi32>
    %50 = vector.broadcast %49 : vector<1x128xi32> to vector<32x128xi32>
    %51 = arith.cmpi eq, %50, %17 : vector<32x128xi32>
    %52 = arith.extui %51 : vector<32x128xi1> to vector<32x128xi32>
    %53 = arith.sitofp %52 : vector<32x128xi32> to vector<32x128xf32>
    %54 = arith.addf %48, %53 : vector<32x128xf32>
    %55 = vector.extract_strided_slice %16 {offsets = [6, 0], sizes = [1, 128], strides = [1, 1]} : vector<8x128xi32> to vector<1x128xi32>
    %56 = vector.broadcast %55 : vector<1x128xi32> to vector<32x128xi32>
    %57 = arith.cmpi eq, %56, %17 : vector<32x128xi32>
    %58 = arith.extui %57 : vector<32x128xi1> to vector<32x128xi32>
    %59 = arith.sitofp %58 : vector<32x128xi32> to vector<32x128xf32>
    %60 = arith.addf %54, %59 : vector<32x128xf32>
    %61 = vector.extract_strided_slice %16 {offsets = [7, 0], sizes = [1, 128], strides = [1, 1]} : vector<8x128xi32> to vector<1x128xi32>
    %62 = vector.broadcast %61 : vector<1x128xi32> to vector<32x128xi32>
    %63 = arith.cmpi eq, %62, %17 : vector<32x128xi32>
    %64 = arith.extui %63 : vector<32x128xi1> to vector<32x128xi32>
    %65 = arith.sitofp %64 : vector<32x128xi32> to vector<32x128xf32>
    %66 = arith.addf %60, %65 : vector<32x128xf32>
    %c0_16 = arith.constant 0 : index
    %c0_17 = arith.constant 0 : index
    %67 = vector.load %arg8[%c0_16, %c0_17] : memref<128x32xbf16, #tpu.memory_space<vmem>>, vector<128x32xbf16>
    %68 = arith.truncf %66 : vector<32x128xf32> to vector<32x128xbf16>
    %cst_18 = arith.constant dense<0.000000e+00> : vector<128x128xf32>
    %69 = tpu.matmul %67, %68, %cst_18 {dimension_numbers = #tpu.dot_dimension_numbers<[1], [0], [0], [1], [0, 0, 1, 1], [], []>} : vector<128x32xbf16>, vector<32x128xbf16>, vector<128x128xf32> -> vector<128x128xf32>
    %c0_19 = arith.constant 0 : index
    %c0_20 = arith.constant 0 : index
    %70 = vector.load %arg9[%c0_19, %c0_20] : memref<128x1xf32, #tpu.memory_space<vmem>>, vector<128x1xf32>
    %71 = vector.broadcast %70 : vector<128x1xf32> to vector<128x128xf32>
    %72 = arith.addf %69, %71 : vector<128x128xf32>
    %73 = tpu.iota {dimensions = array<i32: 1>} : vector<1x128xi32>
    %c32_i32 = arith.constant 32 : i32
    %74 = vector.broadcast %c32_i32 : i32 to vector<1x128xi32>
    %75 = arith.cmpi slt, %73, %74 : vector<1x128xi32>
    %c7_i32 = arith.constant 7 : i32
    %76 = vector.broadcast %c7_i32 : i32 to vector<1x128xi32>
    %77 = arith.andi %73, %76 : vector<1x128xi32>
    %c6_i32 = arith.constant 6 : i32
    %78 = vector.broadcast %c6_i32 : i32 to vector<1x128xi32>
    %79 = arith.cmpi sle, %77, %78 : vector<1x128xi32>
    %80 = arith.andi %75, %79 : vector<1x128xi1>
    %81 = arith.extui %80 : vector<1x128xi1> to vector<1x128xi32>
    %82 = arith.sitofp %81 : vector<1x128xi32> to vector<1x128xf32>
    %83 = arith.mulf %72, %72 : vector<128x128xf32>
    %cst_21 = arith.constant dense<0.000000e+00> : vector<128xf32>
    %84 = vector.multi_reduction <add>, %83, %cst_21 [0] : vector<128x128xf32> to vector<128xf32>
    %85 = vector.shape_cast %84 : vector<128xf32> to vector<1x128xf32>
    %cst_22 = arith.constant 9.99999996E-13 : f32
    %86 = vector.broadcast %cst_22 : f32 to vector<1x128xf32>
    %87 = arith.addf %85, %86 : vector<1x128xf32>
    %88 = math.rsqrt %87 : vector<1x128xf32>
    %89 = arith.mulf %82, %88 : vector<1x128xf32>
    %90 = vector.broadcast %89 : vector<1x128xf32> to vector<128x128xf32>
    %91 = arith.mulf %72, %90 : vector<128x128xf32>
    %c0_23 = arith.constant 0 : index
    %92 = memref.load %arg1[%c0_23] : memref<1xf32, #tpu.memory_space<smem>>
    %93 = arith.mulf %14, %14 : vector<8x128xf32>
    %cst_24 = arith.constant dense<0.000000e+00> : vector<8xf32>
    %94 = vector.multi_reduction <add>, %93, %cst_24 [1] : vector<8x128xf32> to vector<8xf32>
    %95 = vector.shape_cast %94 : vector<8xf32> to vector<8x1xf32>
    %cst_25 = arith.constant 9.99999996E-13 : f32
    %96 = vector.broadcast %cst_25 : f32 to vector<8x1xf32>
    %97 = arith.addf %95, %96 : vector<8x1xf32>
    %98 = math.rsqrt %97 : vector<8x1xf32>
    %99 = vector.broadcast %92 : f32 to vector<8x1xf32>
    %100 = arith.mulf %99, %98 : vector<8x1xf32>
    %101 = vector.broadcast %100 : vector<8x1xf32> to vector<8x128xf32>
    %102 = arith.mulf %14, %101 : vector<8x128xf32>
    %cst_26 = arith.constant dense<0.000000e+00> : vector<8x128xf32>
    %103 = tpu.matmul %102, %91, %cst_26 {dimension_numbers = #tpu.dot_dimension_numbers<[1], [0], [0], [1], [0, 0, 1, 1], [], []>} : vector<8x128xf32>, vector<128x128xf32>, vector<8x128xf32> -> vector<8x128xf32>
    %c0_27 = arith.constant 0 : index
    %c0_28 = arith.constant 0 : index
    %c0_29 = arith.constant 0 : index
    %104 = vector.load %arg10[%c0_27, %c0_28, %c0_29] : memref<1x8x128xf32, #tpu.memory_space<vmem>>, vector<1x8x128xf32>
    %105 = vector.shape_cast %104 : vector<1x8x128xf32> to vector<8x128xf32>
    %106 = vector.shape_cast %103 : vector<8x128xf32> to vector<1x8x128xf32>
    tpu.vector_store %arg10[%c0_27, %c0_28, %c0_29], %106 {strides = array<i32>} : memref<1x8x128xf32, #tpu.memory_space<vmem>>, vector<1x8x128xf32>,
    return
  }
  func.func @transform_0(%arg0: i32) -> i32 {
    %c0_i32 = arith.constant 0 : i32
    %c0_i32_0 = arith.constant 0 : i32
    return %c0_i32 : i32
  }
  func.func @transform_1(%arg0: i32) -> (i32, i32, i32) {
    %c0_i32 = arith.constant 0 : i32
    %c0_i32_0 = arith.constant 0 : i32
    %c0_i32_1 = arith.constant 0 : i32
    return %arg0, %c0_i32, %c0_i32_0 : i32, i32, i32
  }
  func.func @transform_2(%arg0: i32) -> (i32, i32, i32) {
    %c0_i32 = arith.constant 0 : i32
    %c0_i32_0 = arith.constant 0 : i32
    %c0_i32_1 = arith.constant 0 : i32
    return %arg0, %c0_i32, %c0_i32_0 : i32, i32, i32
  }
  func.func @transform_3(%arg0: i32) -> (i32, i32) {
    %c0_i32 = arith.constant 0 : i32
    %c0_i32_0 = arith.constant 0 : i32
    %c0_i32_1 = arith.constant 0 : i32
    return %c0_i32, %c0_i32_0 : i32, i32
  }
  func.func @transform_4(%arg0: i32) -> (i32, i32) {
    %c0_i32 = arith.constant 0 : i32
    %c0_i32_0 = arith.constant 0 : i32
    %c0_i32_1 = arith.constant 0 : i32
    return %c0_i32, %c0_i32_0 : i32, i32
  }
  func.func @transform_5(%arg0: i32) -> (i32, i32) {
    %c0_i32 = arith.constant 0 : i32
    %c0_i32_0 = arith.constant 0 : i32
    %c0_i32_1 = arith.constant 0 : i32
    return %c0_i32, %c0_i32_0 : i32, i32
  }
  func.func @transform_6(%arg0: i32) -> (i32, i32) {
    %c0_i32 = arith.constant 0 : i32
    %c0_i32_0 = arith.constant 0 : i32
    %c0_i32_1 = arith.constant 0 : i32
    return %c0_i32, %c0_i32_0 : i32, i32
  }
  func.func @transform_7(%arg0: i32) -> (i32, i32) {
    %c0_i32 = arith.constant 0 : i32
    %c0_i32_0 = arith.constant 0 : i32
    %c0_i32_1 = arith.constant 0 : i32
    return %c0_i32, %c0_i32_0 : i32, i32
  }
  func.func @transform_8(%arg0: i32) -> (i32, i32) {
    %c0_i32 = arith.constant 0 : i32
    %c0_i32_0 = arith.constant 0 : i32
    %c0_i32_1 = arith.constant 0 : i32
    return %c0_i32, %c0_i32_0 : i32, i32
  }
  func.func @transform_9(%arg0: i32) -> (i32, i32, i32) {
    %c0_i32 = arith.constant 0 : i32
    %c0_i32_0 = arith.constant 0 : i32
    %c0_i32_1 = arith.constant 0 : i32
    return %arg0, %c0_i32, %c0_i32_0 : i32, i32, i32
  }
}

</mosaic_0001>

<bundles_post_ra>
// kernel: neg.3
= control target key start
LH: loop header
LB: loop body
LE: loop exit
PB: predicated region body
PF: predicated region fallthrough
CT: control target
= control target key end

     0   :  { %s24_s0 = inlined_call_operand.vmem [shape: f32[4,6], index: 0, kind: input, shape index: {}]   ;;  %s25_s1 = inlined_call_operand.vmem [shape: f32[4,6], index: 1, kind: output, shape index: {}]  }
   0x1   :  { %v2_v0 = vld [vmem:[%s24_s0] sm:$0x3f] }
   0x2   :  { %v5_v1 = vxor.u32 2147483648, %v2_v0 }
   0x4   :  { %7 = vst [vmem:[%s25_s1] sm:$0xff] %v5_v1 }

// kernel: clipnet_forward.1
= control target key start
LH: loop header
LB: loop body
LE: loop exit
PB: predicated region body
PF: predicated region fallthrough
CT: control target
= control target key end

     0   :  { %v859_v57 = vlaneseq  ;;  %s2446_s3 = inlined_call_operand.vmem [shape: bf16[1024,128], index: 3, kind: input, shape index: {}]   ;;  %s2447_s1 = inlined_call_operand.vmem [shape: bf16[1,8,1024], index: 1, kind: input, shape index: {}]   ;;  %s2448_s2 = inlined_call_operand.vmem [shape: s32[1,8,128], index: 2, kind: input, shape index: {}]   ;;  %s2449_s7 = inlined_call_operand.vmem [shape: bf16[128,32], index: 7, kind: input, shape index: {}]   ;;  %s2450_s5 = inlined_call_operand.vmem [shape: bf16[128,128], index: 5, kind: input, shape index: {}]   ;;  %s2451_s8 = inlined_call_operand.vmem [shape: f32[128,1], index: 8, kind: input, shape index: {}]   ;;  %s2452_s4 = inlined_call_operand.vmem [shape: f32[1,128], index: 4, kind: input, shape index: {}]   ;;  %s2453_s6 = inlined_call_operand.vmem [shape: f32[1,128], index: 6, kind: input, shape index: {}]   ;;  %s2454_s0 = inlined_call_operand.<no memory space> [shape: f32[1], index: 0, kind: input, shape index: {}]   ;;  %s2455_s9 = inlined_call_operand.vmem [shape: f32[1,8,128], index: 9, kind: output, shape index: {}]  }
   0x1   :  { %v1783_v0 = vld [vmem:[%s2446_s3 + $0x78] sm:$0xff]   ;;  %v1787_v4 = vld [vmem:[%s2446_s3 + $0x70] sm:$0xff]   ;;  %v1791_v8 = vld [vmem:[%s2446_s3 + $0x68] sm:$0xff]  }
   0x2   :  { %v1784_v1 = vld [vmem:[%s2446_s3 + $0xf8] sm:$0xff]   ;;  %1579 = vmatprep.subr.bf16.mxu0 %v1783_v0  ;;  %v1788_v5 = vld [vmem:[%s2446_s3 + $0xf0] sm:$0xff]   ;;  %v1792_v9 = vld [vmem:[%s2446_s3 + $0xe8] sm:$0xff]   ;;  %v2100_v62 = vshrl.u32 %v859_v57, 7 }
   0x3   :  { %v1785_v2 = vld [vmem:[%s2446_s3 + $0x38] sm:$0xff]   ;;  %1601 = vmatprep.subr.bf16.mxu1 %v1784_v1  ;;  %v1789_v6 = vld [vmem:[%s2446_s3 + $0x30] sm:$0xff]   ;;  %v1793_v10 = vld [vmem:[%s2446_s3 + $0x28] sm:$0xff]  }
   0x4   :  { %v1786_v3 = vld [vmem:[%s2446_s3 + $0xb8] sm:$0xff]   ;;  %1580 = vmatpush3.bf16.msra.mxu0 %v1785_v2  ;;  %v1790_v7 = vld [vmem:[%s2446_s3 + $0xb0] sm:$0xff]   ;;  %v1794_v11 = vld [vmem:[%s2446_s3 + $0xa8] sm:$0xff]   ;;  %v2109_v1 = vadd.s32 16, %v2100_v62 }
   0x5   :  { %1602 = vmatpush3.bf16.msra.mxu1 %v1786_v3  ;;  %1581 = vmatprep.subr.bf16.mxu0 %v1787_v4  ;;  %v1795_v12 = vld [vmem:[%s2446_s3 + $0x60] sm:$0xff]   ;;  %v1799_v16 = vld [vmem:[%s2446_s3 + $0x58] sm:$0xff]   ;;  %v1803_v20 = vld [vmem:[%s2446_s3 + $0x50] sm:$0xff]   ;;  %v2115_v3 = vadd.s32 24, %v2100_v62 }
   0x6   :  { %1603 = vmatprep.subr.bf16.mxu1 %v1788_v5  ;;  %v1796_v13 = vld [vmem:[%s2446_s3 + $0xe0] sm:$0xff]   ;;  %v1800_v17 = vld [vmem:[%s2446_s3 + $0xd8] sm:$0xff]   ;;  %v1804_v21 = vld [vmem:[%s2446_s3 + $0xd0] sm:$0xff]   ;;  %v866_v5 = vsub.s32 0, %v2100_v62 }
   0x7   :  { %v1797_v14 = vld [vmem:[%s2446_s3 + $0x20] sm:$0xff]   ;;  %v1801_v18 = vld [vmem:[%s2446_s3 + $0x18] sm:$0xff]   ;;  %v1805_v22 = vld [vmem:[%s2446_s3 + $0x10] sm:$0xff]  }
   0x8   :  { %1582 = vmatpush3.bf16.msra.mxu0 %v1789_v6  ;;  %v1798_v15 = vld [vmem:[%s2446_s3 + $0xa0] sm:$0xff]   ;;  %v1802_v19 = vld [vmem:[%s2446_s3 + $0x98] sm:$0xff]   ;;  %v1806_v23 = vld [vmem:[%s2446_s3 + $0x90] sm:$0xff]  }
   0x9   :  { %1604 = vmatpush3.bf16.msra.mxu1 %v1790_v7  ;;  %1583 = vmatprep.subr.bf16.mxu0 %v1791_v8  ;;  %v1807_v24 = vld [vmem:[%s2446_s3 + $0x48] sm:$0xff]   ;;  %v1811_v28 = vld [vmem:[%s2446_s3 + $0x40] sm:$0xff]   ;;  %v1819_v38 = vld [vmem:[%s2446_s3 + $0x178] sm:$0xff]   ;;  %v886_v7 = vsub.s32 1, %v2100_v62 }
   0xa   :  { %1605 = vmatprep.subr.bf16.mxu1 %v1792_v9  ;;  %v1808_v25 = vld [vmem:[%s2446_s3 + $0xc8] sm:$0xff]   ;;  %v1812_v29 = vld [vmem:[%s2446_s3 + $0xc0] sm:$0xff]   ;;  %v1820_v39 = vld [vmem:[%s2446_s3 + $0x1f8] sm:$0xff]   ;;  %v906_v9 = vsub.s32 2, %v2100_v62 }
   0xb   :  { %v1809_v26 = vld [vmem:[%s2446_s3 + $0x8] sm:$0xff]   ;;  %v1813_v30 = vld [vmem:[%s2446_s3] sm:$0xff]   ;;  %v1821_v40 = vld [vmem:[%s2446_s3 + $0x138] sm:$0xff]  }
   0xc   :  { %1584 = vmatpush3.bf16.msra.mxu0 %v1793_v10  ;;  %v1810_v27 = vld [vmem:[%s2446_s3 + $0x88] sm:$0xff]   ;;  %v1814_v31 = vld [vmem:[%s2446_s3 + $0x80] sm:$0xff]   ;;  %v1822_v41 = vld [vmem:[%s2446_s3 + $0x1b8] sm:$0xff]  }
   0xd   :  { %1606 = vmatpush3.bf16.msra.mxu1 %v1794_v11  ;;  %1585 = vmatprep.subr.bf16.mxu0 %v1795_v12  ;;  %v34_v32 = vld [vmem:[%s2447_s1] sm:$0xff]  ;;  %v35_v33 = vld [vmem:[%s2447_s1 + $0x8] sm:$0xff]  ;;  %v1823_v42 = vld [vmem:[%s2446_s3 + $0x170] sm:$0xff]   ;;  %v926_v11 = vsub.s32 3, %v2100_v62 }
   0xe   :  { %1607 = vmatprep.subr.bf16.mxu1 %v1796_v13  ;;  %v1449_v34 = vcombine.low %v34_v32, %v34_v32  ;;  %v1450_v35 = vcombine.high %v34_v32, %v34_v32  ;;  %v1451_v36 = vcombine.low %v35_v33, %v35_v33  ;;  %v1452_v37 = vcombine.high %v35_v33, %v35_v33  ;;  %v1824_v43 = vld [vmem:[%s2446_s3 + $0x1f0] sm:$0xff]   ;;  %v1827_v46 = vld [vmem:[%s2446_s3 + $0x168] sm:$0xff]   ;;  %v1831_v50 = vld [vmem:[%s2446_s3 + $0x160] sm:$0xff]  }
   0xf   :  { %v1825_v44 = vld [vmem:[%s2446_s3 + $0x130] sm:$0xff]   ;;  %v1828_v47 = vld [vmem:[%s2446_s3 + $0x1e8] sm:$0xff]   ;;  %v1832_v51 = vld [vmem:[%s2446_s3 + $0x1e0] sm:$0xff]   ;;  %v946_v13 = vsub.s32 4, %v2100_v62  ;;  %v1875_v32 = vmov 0.0  }
  0x10   :  { %1586 = vmatpush3.bf16.msra.mxu0 %v1797_v14  ;;  %617 = vmatprep.mubr.bf16.mxu0 %v1450_v35  ;;  %v1826_v45 = vld [vmem:[%s2446_s3 + $0x1b0] sm:$0xff]   ;;  %v1829_v48 = vld [vmem:[%s2446_s3 + $0x128] sm:$0xff]   ;;  %v1833_v52 = vld [vmem:[%s2446_s3 + $0x120] sm:$0xff]  }
  0x11   :  { %1608 = vmatpush3.bf16.msra.mxu1 %v1798_v15  ;;  %1587 = vmatprep.subr.bf16.mxu0 %v1799_v16  ;;  %v1830_v49 = vld [vmem:[%s2446_s3 + $0x1a8] sm:$0xff]   ;;  %v1834_v53 = vld [vmem:[%s2446_s3 + $0x1a0] sm:$0xff]   ;;  %v1835_v54 = vld [vmem:[%s2446_s3 + $0x158] sm:$0xff]   ;;  %v966_v16 = vsub.s32 5, %v2100_v62 }
  0x12   :  { %1609 = vmatprep.subr.bf16.mxu1 %v1800_v17  ;;  %657 = vmatprep.mubr.bf16.mxu1 %v1452_v37  ;;  %v1836_v55 = vld [vmem:[%s2446_s3 + $0x1d8] sm:$0xff]   ;;  %v1839_v59 = vld [vmem:[%s2446_s3 + $0x150] sm:$0xff]   ;;  %v1843_v0 = vld [vmem:[%s2446_s3 + $0x148] sm:$0xff]   ;;  %v986_v17 = vsub.s32 6, %v2100_v62 }
  0x13   :  { %v1837_v56 = vld [vmem:[%s2446_s3 + $0x118] sm:$0xff]   ;;  %v1840_v60 = vld [vmem:[%s2446_s3 + $0x1d0] sm:$0xff]   ;;  %v1844_v2 = vld [vmem:[%s2446_s3 + $0x1c8] sm:$0xff]  }
  0x14   :  { %1588 = vmatpush3.bf16.msra.mxu0 %v1801_v18  ;;  %v1838_v58 = vld [vmem:[%s2446_s3 + $0x198] sm:$0xff]   ;;  %v1841_v61 = vld [vmem:[%s2446_s3 + $0x110] sm:$0xff]   ;;  %v1845_v4 = vld [vmem:[%s2446_s3 + $0x108] sm:$0xff]  }
  0x15   :  { %1610 = vmatpush3.bf16.msra.mxu1 %v1802_v19  ;;  %1589 = vmatprep.subr.bf16.mxu0 %v1803_v20  ;;  %v1842_v63 = vld [vmem:[%s2446_s3 + $0x190] sm:$0xff]   ;;  %v1846_v6 = vld [vmem:[%s2446_s3 + $0x188] sm:$0xff]   ;;  %v1847_v8 = vld [vmem:[%s2446_s3 + $0x140] sm:$0xff]  }
  0x16   :  { %1611 = vmatprep.subr.bf16.mxu1 %v1804_v21  ;;  %v1848_v10 = vld [vmem:[%s2446_s3 + $0x1c0] sm:$0xff]   ;;  %v36_v15 = vld [vmem:[%s2447_s1 + $0x10] sm:$0xff]  ;;  %v37_v20 = vld [vmem:[%s2447_s1 + $0x18] sm:$0xff] }
  0x17   :  { %v1849_v12 = vld [vmem:[%s2446_s3 + $0x100] sm:$0xff]   ;;  %v1453_v18 = vcombine.low %v36_v15, %v36_v15  ;;  %v1454_v19 = vcombine.high %v36_v15, %v36_v15 }
  0x18   :  { %1590 = vmatpush3.bf16.msra.mxu0 %v1805_v22  ;;  %v1850_v14 = vld [vmem:[%s2446_s3 + $0x180] sm:$0xff]   ;;  %v1455_v22 = vcombine.low %v37_v20, %v37_v20 }
  0x19   :  { %1612 = vmatpush3.bf16.msra.mxu1 %v1806_v23  ;;  %1591 = vmatprep.subr.bf16.mxu0 %v1807_v24  ;;  %v858_v21 = vld [vmem:[%s2448_s2] sm:$0xff]  ;;  %v1456_v23 = vcombine.high %v37_v20, %v37_v20 }
  0x1a   :  { %1613 = vmatprep.subr.bf16.mxu1 %v1808_v25  ;;  %v2151_v24 = vrot.slane %v858_v21, %v866_v5  ;;  %v1006_v25 = vsub.s32 7, %v2100_v62 }
  0x1c   :  { %1592 = vmatpush3.bf16.msra.mxu0 %v1809_v26  ;;  %v2154_v26 = vrot.slane %v858_v21, %v886_v7  ;;  %vm870_vm0 = vcmp.eq.s32.totalorder %v2151_v24, %v2109_v1  ;;  %vm871_vm1 = vcmp.eq.s32.totalorder %v2151_v24, %v2115_v3 }
  0x1d   :  { %1614 = vmatpush3.bf16.msra.mxu1 %v1810_v27  ;;  %1593 = vmatprep.subr.bf16.mxu0 %v1811_v28  ;;  %v2156_v27 = vrot.slane %v858_v21, %v906_v9  ;;  %v2158_v28 = vrot.slane %v858_v21, %v926_v11  ;;  %v1532_v33 = vsel %vm870_vm0, 1.0, %v1875_v32  ;;  %vm868_vm0 = vcmp.eq.s32.totalorder %v2151_v24, %v2100_v62 }
  0x1e   :  { %1615 = vmatprep.subr.bf16.mxu1 %v1812_v29  ;;  %v2160_v29 = vrot.slane %v858_v21, %v946_v13  ;;  %vm890_vm2 = vcmp.eq.s32.totalorder %v2154_v26, %v2109_v1  ;;  %vm891_vm3 = vcmp.eq.s32.totalorder %v2154_v26, %v2115_v3 }
  0x1f   :  { %v1536_v35 = vsel %vm890_vm2, 1.0, %v1875_v32  ;;  %vm910_vm4 = vcmp.eq.s32.totalorder %v2156_v27, %v2109_v1  ;;  %vm911_vm5 = vcmp.eq.s32.totalorder %v2156_v27, %v2115_v3  ;;  %vm930_vm6 = vcmp.eq.s32.totalorder %v2158_v28, %v2109_v1 }
  0x20   :  { %1594 = vmatpush3.bf16.msra.mxu0 %v1813_v30  ;;  %v2166_v30 = vrot.slane %v858_v21, %v966_v16  ;;  %v902_v37 = vadd.f32 %v1536_v35, %v1532_v33  ;;  %vm931_vm7 = vcmp.eq.s32.totalorder %v2158_v28, %v2115_v3  ;;  %vm950_vm8 = vcmp.eq.s32.totalorder %v2160_v29, %v2109_v1 }
  0x21   :  { %1616 = vmatpush3.bf16.msra.mxu1 %v1814_v31  ;;  %1623 = vmatprep.subr.bf16.mxu0 %v1819_v38  ;;  %v2168_v31 = vrot.slane %v858_v21, %v986_v17  ;;  %vm951_vm9 = vcmp.eq.s32.totalorder %v2160_v29, %v2115_v3  ;;  %vm888_vm2 = vcmp.eq.s32.totalorder %v2154_v26, %v2100_v62 }
  0x22   :  { %1645 = vmatprep.subr.bf16.mxu1 %v1820_v39  ;;  %v1540_v39 = vsel %vm910_vm4, 1.0, %v1875_v32  ;;  %vm970_vm10 = vcmp.eq.s32.totalorder %v2166_v30, %v2109_v1  ;;  %vm971_vm11 = vcmp.eq.s32.totalorder %v2166_v30, %v2115_v3  ;;  %vm908_vm4 = vcmp.eq.s32.totalorder %v2156_v27, %v2100_v62 }
  0x23   :  { %618 = vmatmul.mubr.bf16.vlgmr.msra.gmra.mxu0 %v1449_v34  ;;  %v1533_v34 = vsel %vm871_vm1, 1.0, %v1875_v32  ;;  %vm990_vm12 = vcmp.eq.s32.totalorder %v2168_v31, %v2109_v1  ;;  %vm991_vm13 = vcmp.eq.s32.totalorder %v2168_v31, %v2115_v3 }
  0x24   :  { %658 = vmatmul.mubr.bf16.vlgmr.msra.gmra.mxu1 %v1451_v36  ;;  %1624 = vmatpush3.bf16.msra.mxu0 %v1821_v40  ;;  %v1537_v36 = vsel %vm891_vm3, 1.0, %v1875_v32  ;;  %v1541_v40 = vsel %vm911_vm5, 1.0, %v1875_v32 }
  0x25   :  { %1646 = vmatpush3.bf16.msra.mxu1 %v1822_v41  ;;  %1625 = vmatprep.subr.bf16.mxu0 %v1823_v42  ;;  %v903_v38 = vadd.f32 %v1537_v36, %v1533_v34  ;;  %v922_v41 = vadd.f32 %v1540_v39, %v902_v37  ;;  %v1857_v37 = vld [vmem:[%s2449_s7 + $0x10] sm:$0xff]  }
  0x26   :  { %1647 = vmatprep.subr.bf16.mxu1 %v1824_v43  ;;  %697 = vmatprep.mubr.bf16.mxu0 %v1454_v19  ;;  %v1544_v43 = vsel %vm930_vm6, 1.0, %v1875_v32  ;;  %vm928_vm6 = vcmp.eq.s32.totalorder %v2158_v28, %v2100_v62  ;;  %v1860_v39 = vld [vmem:[%s2450_s5 + $0x30] sm:$0xff]  }
  0x27   :  { %737 = vmatprep.mubr.bf16.mxu1 %v1456_v23  ;;  %v923_v42 = vadd.f32 %v1541_v40, %v903_v38  ;;  %v1859_v38 = vld [vmem:[%s2450_s5 + $0x38] sm:$0xff]  }
  0x28   :  { %1626 = vmatpush3.bf16.msra.mxu0 %v1825_v44  ;;  %v1545_v44 = vsel %vm931_vm7, 1.0, %v1875_v32  ;;  %v1858_v40 = vld [vmem:[%s2449_s7 + $0x18] sm:$0xff]  }
  0x29   :  { %1648 = vmatpush3.bf16.msra.mxu1 %v1826_v45  ;;  %1627 = vmatprep.subr.bf16.mxu0 %v1827_v46  ;;  %v1548_v45 = vsel %vm950_vm8, 1.0, %v1875_v32  ;;  %v1549_v46 = vsel %vm951_vm9, 1.0, %v1875_v32  ;;  %vm948_vm8 = vcmp.eq.s32.totalorder %v2160_v29, %v2100_v62 }
  0x2a   :  { %1649 = vmatprep.subr.bf16.mxu1 %v1828_v47  ;;  %v942_v47 = vadd.f32 %v1544_v43, %v922_v41  ;;  %v1861_v41 = vld [vmem:[%s2449_s7 + $0x20] sm:$0xff]  }
  0x2b   :  { %v1864_v43 = vld [vmem:[%s2450_s5 + $0x20] sm:$0xff]  }
  0x2c   :  { %1628 = vmatpush3.bf16.msra.mxu0 %v1829_v48  ;;  %v943_v48 = vadd.f32 %v1545_v44, %v923_v42  ;;  %v1863_v42 = vld [vmem:[%s2450_s5 + $0x28] sm:$0xff]  }
  0x2d   :  { %1650 = vmatpush3.bf16.msra.mxu1 %v1830_v49  ;;  %1629 = vmatprep.subr.bf16.mxu0 %v1831_v50  ;;  %v1552_v49 = vsel %vm970_vm10, 1.0, %v1875_v32  ;;  %v1553_v50 = vsel %vm971_vm11, 1.0, %v1875_v32  ;;  %vm968_vm10 = vcmp.eq.s32.totalorder %v2166_v30, %v2100_v62  ;;  %v1862_v44 = vld [vmem:[%s2449_s7 + $0x28] sm:$0xff]  }
  0x2e   :  { %1651 = vmatprep.subr.bf16.mxu1 %v1832_v51  ;;  %v2207_v51 = vrot.slane %v858_v21, %v1006_v25 }
  0x30   :  { %1630 = vmatpush3.bf16.msra.mxu0 %v1833_v52  ;;  %v962_v52 = vadd.f32 %v1548_v45, %v942_v47  ;;  %vm1010_vm14 = vcmp.eq.s32.totalorder %v2207_v51, %v2109_v1  ;;  %vm1011_vm15 = vcmp.eq.s32.totalorder %v2207_v51, %v2115_v3  ;;  %v1530_v1 = vsel %vm868_vm0, 1.0, %v1875_v32  ;;  %v1865_v45 = vld [vmem:[%s2449_s7 + $0x30] sm:$0xff]   ;;  %v1866_v47 = vld [vmem:[%s2449_s7 + $0x38] sm:$0xff]  }
  0x31   :  { %1652 = vmatpush3.bf16.msra.mxu1 %v1834_v53  ;;  %1631 = vmatprep.subr.bf16.mxu0 %v1835_v54  ;;  %v963_v53 = vadd.f32 %v1549_v46, %v943_v48  ;;  %v1556_v54 = vsel %vm990_vm12, 1.0, %v1875_v32  ;;  %vm988_vm12 = vcmp.eq.s32.totalorder %v2168_v31, %v2100_v62  ;;  %vm1178_vm0 = vcmask 261120   ;;  %v1867_v46 = vld [vmem:[%s2450_s5 + $0x18] sm:$0xff]   ;;  %v1868_v48 = vld [vmem:[%s2450_s5 + $0x10] sm:$0xff]  }
  0x32   :  { %1653 = vmatprep.subr.bf16.mxu1 %v1836_v55  ;;  %v1557_v55 = vsel %vm991_vm13, 1.0, %v1875_v32 }
  0x34   :  { %1632 = vmatpush3.bf16.msra.mxu0 %v1837_v56  ;;  %v982_v56 = vadd.f32 %v1552_v49, %v962_v52  ;;  %v1869_v49 = vld [vmem:[%s2450_s5 + $0x8] sm:$0xff]   ;;  %v1042_v52 = vld [vmem:[%s2451_s8] sm:$0xff] }
  0x35   :  { %1654 = vmatpush3.bf16.msra.mxu1 %v1838_v58  ;;  %1633 = vmatprep.subr.bf16.mxu0 %v1839_v59  ;;  %v983_v58 = vadd.f32 %v1553_v50, %v963_v53  ;;  %v1560_v59 = vsel %vm1010_vm14, 1.0, %v1875_v32  ;;  %vm1008_vm14 = vcmp.eq.s32.totalorder %v2207_v51, %v2100_v62  ;;  %v1870_v50 = vld [vmem:[%s2450_s5] sm:$0xff]   ;;  %v1044_v53 = vld [vmem:[%s2451_s8 + $0x10] sm:$0xff] }
  0x36   :  { %1655 = vmatprep.subr.bf16.mxu1 %v1840_v60  ;;  %v1561_v60 = vsel %vm1011_vm15, 1.0, %v1875_v32 }
  0x38   :  { %1634 = vmatpush3.bf16.msra.mxu0 %v1841_v61  ;;  %v1002_v61 = vadd.f32 %v1556_v54, %v982_v56  ;;  %v1043_v54 = vld [vmem:[%s2451_s8 + $0x8] sm:$0xff]  ;;  %v1046_v56 = vld [vmem:[%s2451_s8 + $0x20] sm:$0xff] }
  0x39   :  { %1656 = vmatpush3.bf16.msra.mxu1 %v1842_v63  ;;  %1635 = vmatprep.subr.bf16.mxu0 %v1843_v0  ;;  %v1003_v63 = vadd.f32 %v1557_v55, %v983_v58  ;;  %v1045_v55 = vld [vmem:[%s2451_s8 + $0x18] sm:$0xff]  ;;  %v1047_v58 = vld [vmem:[%s2451_s8 + $0x28] sm:$0xff] }
  0x3a   :  { %1657 = vmatprep.subr.bf16.mxu1 %v1844_v2  ;;  %v1022_v0 = vadd.f32 %v1560_v59, %v1002_v61  ;;  %v1048_v59 = vld [vmem:[%s2451_s8 + $0x30] sm:$0xff]  ;;  %v1050_v61 = vld [vmem:[%s2451_s8 + $0x40] sm:$0xff] }
  0x3b   :  { %v1023_v2 = vadd.f32 %v1561_v60, %v1003_v63  ;;  %v1049_v60 = vld [vmem:[%s2451_s8 + $0x38] sm:$0xff]  ;;  %v1051_v63 = vld [vmem:[%s2451_s8 + $0x48] sm:$0xff] }
  0x3c   :  { %1636 = vmatpush3.bf16.msra.mxu0 %v1845_v4  ;;  %v861_v4 = vadd.s32 8, %v2100_v62  ;;  %v1856_v62 = vld [vmem:[%s2449_s7 + $0x8] sm:$0xff]  }
  0x3d   :  { %1658 = vmatpush3.bf16.msra.mxu1 %v1846_v6  ;;  %1637 = vmatprep.subr.bf16.mxu0 %v1847_v8  ;;  %v1041_v5 = vpack.c.bf16 %v1023_v2, %v1022_v0  ;;  %v1534_v6 = vsel %vm888_vm2, 1.0, %v1875_v32  ;;  %v1052_v0 = vld [vmem:[%s2451_s8 + $0x50] sm:$0xff]  ;;  %v1053_v2 = vld [vmem:[%s2451_s8 + $0x58] sm:$0xff] }
  0x3e   :  { %1659 = vmatprep.subr.bf16.mxu1 %v1848_v10  ;;  %vm869_vm1 = vcmp.eq.s32.totalorder %v2151_v24, %v861_v4  ;;  %vm889_vm3 = vcmp.eq.s32.totalorder %v2154_v26, %v861_v4  ;;  %v900_v8 = vadd.f32 %v1534_v6, %v1530_v1  ;;  %vm909_vm5 = vcmp.eq.s32.totalorder %v2156_v27, %v861_v4  ;;  %v1056_v1 = vld [vmem:[%s2451_s8 + $0x70] sm:$0xff] }
  0x3f   :  { %v1531_v3 = vsel %vm869_vm1, 1.0, %v1875_v32  ;;  %v1535_v7 = vsel %vm889_vm3, 1.0, %v1875_v32  ;;  %v1538_v10 = vsel %vm908_vm4, 1.0, %v1875_v32  ;;  %v1539_v11 = vsel %vm909_vm5, 1.0, %v1875_v32 }
  0x40   :  { %1638 = vmatpush3.bf16.msra.mxu0 %v1849_v12  ;;  %v901_v9 = vadd.f32 %v1535_v7, %v1531_v3  ;;  %v920_v12 = vadd.f32 %v1538_v10, %v900_v8  ;;  %vm929_vm7 = vcmp.eq.s32.totalorder %v2158_v28, %v861_v4  ;;  %vm949_vm9 = vcmp.eq.s32.totalorder %v2160_v29, %v861_v4  ;;  %v1057_v3 = vld [vmem:[%s2451_s8 + $0x78] sm:$0xff] }
  0x41   :  { %1660 = vmatpush3.bf16.msra.mxu1 %v1850_v14  ;;  %1703 = vmatprep.subr.bf16.mxu0 %v1875_v32  ;;  %v1542_v14 = vsel %vm928_vm6, 1.0, %v1875_v32  ;;  %v1543_v15 = vsel %vm929_vm7, 1.0, %v1875_v32  ;;  %v1547_v19 = vsel %vm949_vm9, 1.0, %v1875_v32  ;;  %vm969_vm11 = vcmp.eq.s32.totalorder %v2166_v30, %v861_v4 }
  0x42   :  { %1723 = vmatprep.subr.bf16.mxu1 %v1041_v5  ;;  %v921_v13 = vadd.f32 %v1539_v11, %v901_v9  ;;  %v940_v16 = vadd.f32 %v1542_v14, %v920_v12  ;;  %v1551_v23 = vsel %vm969_vm11, 1.0, %v1875_v32  ;;  %vm989_vm13 = vcmp.eq.s32.totalorder %v2168_v31, %v861_v4  ;;  %v1855_v31 = vld [vmem:[%s2449_s7] sm:$0xff]  }
  0x43   :  { %698 = vmatmul.mubr.bf16.vlgmr.msra.gmra.mxu0 %v1453_v18  ;;  %v1546_v18 = vsel %vm948_vm8, 1.0, %v1875_v32  ;;  %v1554_v26 = vsel %vm988_vm12, 1.0, %v1875_v32  ;;  %v1555_v27 = vsel %vm989_vm13, 1.0, %v1875_v32  ;;  %vm1009_vm15 = vcmp.eq.s32.totalorder %v2207_v51, %v861_v4  ;;  %v1054_v4 = vld [vmem:[%s2451_s8 + $0x60] sm:$0xff] }
  0x44   :  { %738 = vmatmul.mubr.bf16.vlgmr.msra.gmra.mxu1 %v1455_v22  ;;  %v941_v17 = vadd.f32 %v1543_v15, %v921_v13  ;;  %v960_v20 = vadd.f32 %v1546_v18, %v940_v16  ;;  %v1550_v22 = vsel %vm968_vm10, 1.0, %v1875_v32  ;;  %v1558_v30 = vsel %vm1008_vm14, 1.0, %v1875_v32  ;;  %1704 = vmatpush3.bf16.msra.mxu0 %v1859_v38  ;;  %v1448_v15 = vld [vmem:[%s2452_s4] ss:$0 sm:$0xff] }
  0x45   :  { %1724 = vmatpush3.bf16.msra.mxu1 %v1041_v5  ;;  %v1559_v33 = vsel %vm1009_vm15, 1.0, %v1875_v32  ;;  %1727 = vmatprep.mubr.msk.bf16.mxu1 %vm1178_vm0, %v1855_v31  ;;  %vm1876_vm1 = vmmov 0   ;;  %v1877_v51 = vmov 0   ;;  %v1055_v5 = vld [vmem:[%s2451_s8 + $0x68] sm:$0xff] }
  0x46   :  { %v961_v21 = vadd.f32 %v1547_v19, %v941_v17  ;;  %v980_v24 = vadd.f32 %v1550_v22, %v960_v20  ;;  %1705 = vmatprep.subr.bf16.mxu0 %v1875_v32  ;;  %1719 = vmatprep.mubr.msk.bf16.mxu0 %vm1876_vm1, %v1875_v32 }
  0x47   :  { %1781 = vset.pattern.permute.xlu0 %v1877_v51  ;;  %1782 = vset.pattern.permute.xlu1 %v1877_v51 }
  0x48   :  { %v981_v25 = vadd.f32 %v1551_v23, %v961_v21  ;;  %v1000_v28 = vadd.f32 %v1554_v26, %v980_v24  ;;  %1706 = vmatpush3.bf16.msra.mxu0 %v1860_v39  ;;  %1060 = vperm.xlu0 %1781, %v1042_v52  }
  0x49   :  { %1707 = vmatprep.subr.bf16.mxu0 %v1875_v32  ;;  %1070 = vperm.xlu1 %1782, %v1044_v53  }
  0x4a   :  { %v1001_v29 = vadd.f32 %v1555_v27, %v981_v25  ;;  %v1020_v34 = vadd.f32 %v1558_v30, %v1000_v28 }
  0x4c   :  { %v1021_v35 = vadd.f32 %v1559_v33, %v1001_v29  ;;  %1708 = vmatpush3.bf16.msra.mxu0 %v1863_v42  ;;  %1065 = vperm.xlu0 %1781, %v1043_v54  }
  0x4d   :  { %1709 = vmatprep.subr.bf16.mxu0 %v1875_v32  ;;  %1075 = vperm.xlu1 %1782, %v1045_v55  }
  0x4e   :  { %v1040_v36 = vpack.c.bf16 %v1021_v35, %v1020_v34 }
  0x50   :  { %1725 = vmatprep.subr.bf16.mxu1 %v1040_v36  ;;  %1710 = vmatpush3.bf16.msra.mxu0 %v1864_v43 }
  0x51   :  { %1726 = vmatpush3.bf16.msra.mxu1 %v1040_v36  ;;  %1711 = vmatprep.subr.bf16.mxu0 %v1875_v32 }
  0x52   :  { %1743 = vmatprep.subr.mxu1 %v1875_v32  ;;  %1080 = vperm.xlu0 %1781, %v1046_v56  }
  0x53   :  { %1085 = vperm.xlu1 %1782, %v1047_v58  }
  0x54   :  { %1728 = vmatmul.mubr.msk.bf16.vlgmr.msra.gmra.mxu1 %vm1178_vm0, %v1856_v62  ;;  %1712 = vmatpush3.bf16.msra.mxu0 %v1867_v46 }
  0x55   :  { %1731 = vmatprep.mubr.msk.bf16.mxu1 %vm1178_vm0, %v1857_v37  ;;  %1713 = vmatprep.subr.bf16.mxu0 %v1875_v32 }
  0x56   :  { %1090 = vperm.xlu0 %1781, %v1048_v59  }
  0x57   :  { %1095 = vperm.xlu1 %1782, %v1049_v60  }
  0x58   :  { %1714 = vmatpush3.bf16.msra.mxu0 %v1868_v48 }
  0x59   :  { %1715 = vmatprep.subr.bf16.mxu0 %v1875_v32 }
  0x5a   :  { %1100 = vperm.xlu0 %1781, %v1050_v61  }
  0x5b   :  { %1105 = vperm.xlu1 %1782, %v1051_v63  }
  0x5c   :  { %1732 = vmatmul.mubr.msk.bf16.gmra.mxu1 %vm1178_vm0, %v1858_v40  ;;  %1716 = vmatpush3.bf16.msra.mxu0 %v1869_v49 }
  0x5d   :  { %1735 = vmatprep.mubr.msk.bf16.mxu1 %vm1178_vm0, %v1861_v41  ;;  %1717 = vmatprep.subr.bf16.mxu0 %v1875_v32 }
  0x5e   :  { %1110 = vperm.xlu0 %1781, %v1052_v0  }
  0x5f   :  { %1115 = vperm.xlu1 %1782, %v1053_v2  }
  0x60   :  { %1718 = vmatpush3.bf16.msra.mxu0 %v1870_v50 }
  0x62   :  { %1120 = vperm.xlu0 %1781, %v1054_v4  }
  0x63   :  { %1125 = vperm.xlu1 %1782, %v1055_v5  }
  0x64   :  { %1736 = vmatmul.mubr.msk.bf16.gmra.mxu1 %vm1178_vm0, %v1862_v44 }
  0x65   :  { %1739 = vmatprep.mubr.msk.bf16.mxu1 %vm1178_vm0, %v1865_v45 }
  0x66   :  { %1130 = vperm.xlu0 %1781, %v1056_v1  }
  0x67   :  { %1135 = vperm.xlu1 %1782, %v1057_v3  }
  0x6c   :  { %1740 = vmatmul.mubr.msk.bf16.gmra.mxu1 %vm1178_vm0, %v1866_v47 }
  0x6d   :  { %1775 = vmatprep.mubr.msk.f32.mxu1 %vm1876_vm1, %v1875_v32 }
  0xc3   :  { %v1061_v35 = vpop.permute.xlu0 %1060 }
  0xc4   :  { %v1071_v36 = vpop.permute.xlu1 %1070 }
  0xc7   :  { %v1066_v31 = vpop.permute.xlu0 %1065 }
  0xc8   :  { %v1076_v62 = vpop.permute.xlu1 %1075 }
  0xcd   :  { %v1081_v37 = vpop.permute.xlu0 %1080 }
  0xce   :  { %v1086_v38 = vpop.permute.xlu1 %1085 }
  0xd1   :  { %v1091_v41 = vpop.permute.xlu0 %1090 }
  0xd2   :  { %v1096_v44 = vpop.permute.xlu1 %1095 }
  0xd5   :  { %v1101_v51 = vpop.permute.xlu0 %1100 }
  0xd6   :  { %v1106_v55 = vpop.permute.xlu1 %1105 }
  0xd9   :  { %v1111_v4 = vpop.permute.xlu0 %1110 }
  0xe3   :  { %v1595_v6 = vpop.f32.mrf.mxu0 }
  0xe4   :  { %v1617_v7 = vpop.f32.mrf.mxu1 }
  0xe5   :  { %v1596_v8 = vpop.f32.mrf.mxu0 }
  0xe6   :  { %v1618_v9 = vpop.f32.mrf.mxu1  ;;  %v1597_v14 = vadd.f32 %v1596_v8, %v1595_v6 }
  0xe7   :  { %v1598_v10 = vpop.f32.mrf.mxu0  ;;  %v1619_v17 = vadd.f32 %v1618_v9, %v1617_v7  ;;  %v1116_v7 = vpop.permute.xlu1 %1115 }
  0xe8   :  { %v1620_v11 = vpop.f32.mrf.mxu1  ;;  %v620_v16 = vadd.f32 %v1597_v14, %v1448_v15 }
  0xe9   :  { %v1599_v12 = vpop.f32.mrf.mxu0 }
  0xea   :  { %v1621_v13 = vpop.f32.mrf.mxu1  ;;  %v660_v22 = vadd.f32 %v1619_v17, %v620_v16  ;;  %v1121_v16 = vpop.permute.xlu0 %1120 }
 0x103   :  { %v1639_v18 = vpop.f32.mrf.mxu0 }
 0x104   :  { %v1661_v19 = vpop.f32.mrf.mxu1 }
 0x105   :  { %v1640_v20 = vpop.f32.mrf.mxu0 }
 0x106   :  { %v1662_v21 = vpop.f32.mrf.mxu1  ;;  %v1641_v23 = vadd.f32 %v1640_v20, %v1639_v18 }
 0x107   :  { %v1642_v24 = vpop.f32.mrf.mxu0  ;;  %v1663_v27 = vadd.f32 %v1662_v21, %v1661_v19  ;;  %v1126_v21 = vpop.permute.xlu1 %1125 }
 0x108   :  { %v1664_v25 = vpop.f32.mrf.mxu1  ;;  %v700_v26 = vadd.f32 %v1641_v23, %v660_v22 }
 0x109   :  { %v1643_v28 = vpop.f32.mrf.mxu0 }
 0x10a   :  { %v1665_v29 = vpop.f32.mrf.mxu1  ;;  %v740_v30 = vadd.f32 %v1663_v27, %v700_v26 }
 0x10c   :  { %v745_v33 = vmax.f32 %v740_v30, 0.0  ;;  %v1131_v30 = vpop.permute.xlu0 %1130 }
 0x10e   :  { %v746_v34 = vpack.c.bf16 %v745_v33, %v745_v33 }
 0x110   :  { %1720 = vmatmul.mubr.bf16.vlgmr.msra.gmra.mxu0 %v746_v34 }
 0x114   :  { %v1729_v39 = vpop.f32.mrf.mxu1 }
 0x115   :  { %v2377_v45 = vadd.f32 %v1729_v39, %v1071_v36 }
 0x116   :  { %v1237_v40 = vpop.f32.mrf.mxu1 }
 0x117   :  { %v2375_v42 = vadd.f32 %v1237_v40, %v1061_v35  ;;  %v1310_v52 = vmul.f32 %v2377_v45, %v2377_v45 }
 0x118   :  { %v1730_v43 = vpop.f32.mrf.mxu1 }
 0x119   :  { %v1308_v47 = vmul.f32 %v2375_v42, %v2375_v42  ;;  %v2383_v49 = vadd.f32 %v1730_v43, %v1076_v62 }
 0x11a   :  { %v1240_v46 = vpop.f32.mrf.mxu1 }
 0x11b   :  { %v2381_v48 = vadd.f32 %v1240_v46, %v1066_v31  ;;  %v1311_v58 = vmul.f32 %v2383_v49, %v2383_v49  ;;  %v1136_v31 = vpop.permute.xlu1 %1135 }
 0x11c   :  { %v1733_v50 = vpop.f32.mrf.mxu1 }
 0x11d   :  { %v1309_v53 = vmul.f32 %v2381_v48, %v2381_v48  ;;  %v2395_v0 = vadd.f32 %v1733_v50, %v1091_v41 }
 0x11e   :  { %v1253_v54 = vpop.f32.mrf.mxu1 }
 0x11f   :  { %v1324_v56 = vadd.f32 %v1309_v53, %v1308_v47  ;;  %v2391_v59 = vadd.f32 %v1253_v54, %v1081_v37  ;;  %v1314_v10 = vmul.f32 %v2395_v0, %v2395_v0 }
 0x120   :  { %v1734_v60 = vpop.f32.mrf.mxu1 }
 0x121   :  { %v1325_v61 = vadd.f32 %v1324_v56, %v1310_v52  ;;  %v1312_v63 = vmul.f32 %v2391_v59, %v2391_v59  ;;  %v2399_v3 = vadd.f32 %v1734_v60, %v1096_v44 }
 0x122   :  { %v1256_v2 = vpop.f32.mrf.mxu1 }
 0x123   :  { %v1326_v5 = vadd.f32 %v1325_v61, %v1311_v58  ;;  %v2397_v1 = vadd.f32 %v1256_v2, %v1086_v38  ;;  %v1315_v13 = vmul.f32 %v2399_v3, %v2399_v3 }
 0x124   :  { %v1737_v6 = vpop.f32.mrf.mxu1 }
 0x125   :  { %v1327_v8 = vadd.f32 %v1326_v5, %v1312_v63  ;;  %v1313_v9 = vmul.f32 %v2397_v1, %v2397_v1  ;;  %v1278_v19 = vadd.f32 %v1737_v6, %v1111_v4  ;;  %v1301_v63 = vand.u32 127, %v859_v57 }
 0x126   :  { %v1269_v11 = vpop.f32.mrf.mxu1 }
 0x127   :  { %v1328_v12 = vadd.f32 %v1327_v8, %v1313_v9  ;;  %v2407_v14 = vadd.f32 %v1269_v11, %v1101_v51  ;;  %v1318_v28 = vmul.f32 %v1278_v19, %v1278_v19  ;;  %v1303_v4 = vand.u32 7, %v1301_v63 }
 0x128   :  { %v1738_v15 = vpop.f32.mrf.mxu1  ;;  %vm1302_vm2 = vcmp.lt.s32.totalorder %v1301_v63, 32 }
 0x129   :  { %v1329_v17 = vadd.f32 %v1328_v12, %v1314_v10  ;;  %v1316_v18 = vmul.f32 %v2407_v14, %v2407_v14  ;;  %v1281_v24 = vadd.f32 %v1738_v15, %v1116_v7  ;;  %vm1304_vm3 = vcmp.le.s32.totalorder %v1303_v4, 6 }
 0x12a   :  { %v1272_v20 = vpop.f32.mrf.mxu1  ;;  %vm1305_vm4 = vmand %vm1302_vm2, %vm1304_vm3 }
 0x12b   :  { %v1330_v22 = vadd.f32 %v1329_v17, %v1315_v13  ;;  %v1273_v23 = vadd.f32 %v1272_v20, %v1106_v55  ;;  %v1319_v34 = vmul.f32 %v1281_v24, %v1281_v24  ;;  %v1578_v5 = vsel %vm1305_vm4, 1.0, %v1875_v32 }
 0x12c   :  { %v1741_v25 = vpop.f32.mrf.mxu1 }
 0x12d   :  { %v1331_v26 = vadd.f32 %v1330_v22, %v1316_v18  ;;  %v1317_v27 = vmul.f32 %v1273_v23, %v1273_v23  ;;  %v1294_v38 = vadd.f32 %v1741_v25, %v1131_v30 }
 0x12e   :  { %v1285_v29 = vpop.f32.mrf.mxu1 }
 0x12f   :  { %v1332_v33 = vadd.f32 %v1331_v26, %v1317_v27  ;;  %v1286_v35 = vadd.f32 %v1285_v29, %v1121_v16  ;;  %v1322_v47 = vmul.f32 %v1294_v38, %v1294_v38 }
 0x130   :  { %v1742_v36 = vpop.f32.mrf.mxu1 }
 0x131   :  { %v1333_v62 = vadd.f32 %v1332_v33, %v1318_v28  ;;  %v1320_v37 = vmul.f32 %v1286_v35, %v1286_v35  ;;  %v1297_v43 = vadd.f32 %v1742_v36, %v1136_v31 }
 0x132   :  { %v1288_v39 = vpop.f32.mrf.mxu1 }
 0x133   :  { %v1334_v40 = vadd.f32 %v1333_v62, %v1319_v34  ;;  %v1289_v41 = vadd.f32 %v1288_v39, %v1126_v21  ;;  %v1323_v51 = vmul.f32 %v1297_v43, %v1297_v43 }
 0x135   :  { %v1335_v44 = vadd.f32 %v1334_v40, %v1320_v37  ;;  %v1321_v46 = vmul.f32 %v1289_v41, %v1289_v41 }
 0x137   :  { %v1336_v50 = vadd.f32 %v1335_v44, %v1321_v46 }
 0x139   :  { %v1337_v52 = vadd.f32 %v1336_v50, %v1322_v47 }
 0x13b   :  { %v1338_v53 = vadd.f32 %v1337_v52, %v1323_v51 }
 0x13d   :  { %v1339_v54 = vrot.slane %v1338_v53, 4 }
 0x13f   :  { %v1340_v55 = vadd.f32 %v1339_v54, %v1338_v53 }
 0x141   :  { %v1341_v56 = vrot.slane %v1340_v55, 2 }
 0x143   :  { %v1342_v58 = vadd.f32 %v1341_v56, %v1340_v55 }
 0x145   :  { %v1343_v60 = vrot.slane %v1342_v58, 1 }
 0x147   :  { %v1344_v61 = vadd.f32 %v1343_v60, %v1342_v58 }
 0x149   :  { %v1345_v2 = vadd.f32 1e-12, %v1344_v61 }
 0x14b   :  { %1871 = vrsqrt.f32 %v1345_v2 }
 0x158   :  { %v1872_v6 = vpop.eup %1871 }
 0x159   :  { %v1347_v7 = vmul.f32 %v1872_v6, %v1578_v5 }
 0x15b   :  { %v1363_v8 = vmul.f32 %v1347_v7, %v1297_v43  ;;  %v1362_v9 = vmul.f32 %v1347_v7, %v1294_v38  ;;  %v1361_v10 = vmul.f32 %v1347_v7, %v1289_v41  ;;  %v1360_v11 = vmul.f32 %v1347_v7, %v1286_v35 }
 0x15c   :  { %v1359_v57 = vmul.f32 %v1347_v7, %v1281_v24  ;;  %v1358_v12 = vmul.f32 %v1347_v7, %v1278_v19  ;;  %v1357_v13 = vmul.f32 %v1347_v7, %v1273_v23  ;;  %v1356_v15 = vmul.f32 %v1347_v7, %v2407_v14 }
 0x15d   :  { %1744 = vmatpush3.msra.mxu1 %v1363_v8  ;;  %v1355_v16 = vmul.f32 %v1347_v7, %v2399_v3  ;;  %v1354_v17 = vmul.f32 %v1347_v7, %v2395_v0  ;;  %v1353_v18 = vmul.f32 %v1347_v7, %v2397_v1  ;;  %v1352_v14 = vmul.f32 %v1347_v7, %v2391_v59 }
 0x15e   :  { %1745 = vmatprep.subr.mxu1 %v1875_v32  ;;  %v1351_v3 = vmul.f32 %v1347_v7, %v2383_v49  ;;  %v1350_v0 = vmul.f32 %v1347_v7, %v2377_v45  ;;  %v1349_v1 = vmul.f32 %v1347_v7, %v2381_v48  ;;  %v1348_v59 = vmul.f32 %v1347_v7, %v2375_v42  ;;  %v1521_v45 = vld [vmem:[%s2453_s6] ss:$0 sm:$0xff] }
 0x15f   :  { %1746 = vmatpush3.msra.mxu1 %v1362_v9  ;;  %v1370_v42 = vstv %s2454_s0 }
 0x160   :  { %1747 = vmatprep.subr.mxu1 %v1875_v32 }
 0x161   :  { %1748 = vmatpush3.msra.mxu1 %v1361_v10 }
 0x162   :  { %1749 = vmatprep.subr.mxu1 %v1875_v32 }
 0x163   :  { %1750 = vmatpush3.msra.mxu1 %v1360_v11 }
 0x164   :  { %1751 = vmatprep.subr.mxu1 %v1875_v32 }
 0x165   :  { %1752 = vmatpush3.msra.mxu1 %v1359_v57 }
 0x166   :  { %1753 = vmatprep.subr.mxu1 %v1875_v32 }
 0x167   :  { %1754 = vmatpush3.msra.mxu1 %v1358_v12 }
 0x168   :  { %1755 = vmatprep.subr.mxu1 %v1875_v32 }
 0x169   :  { %1756 = vmatpush3.msra.mxu1 %v1357_v13 }
 0x16a   :  { %1757 = vmatprep.subr.mxu1 %v1875_v32 }
 0x16b   :  { %1758 = vmatpush3.msra.mxu1 %v1356_v15 }
 0x16c   :  { %1759 = vmatprep.subr.mxu1 %v1875_v32 }
 0x16d   :  { %1760 = vmatpush3.msra.mxu1 %v1355_v16 }
 0x16e   :  { %1761 = vmatprep.subr.mxu1 %v1875_v32 }
 0x16f   :  { %1762 = vmatpush3.msra.mxu1 %v1354_v17 }
 0x170   :  { %1763 = vmatprep.subr.mxu1 %v1875_v32 }
 0x171   :  { %1764 = vmatpush3.msra.mxu1 %v1353_v18 }
 0x172   :  { %1765 = vmatprep.subr.mxu1 %v1875_v32 }
 0x173   :  { %1766 = vmatpush3.msra.mxu1 %v1352_v14 }
 0x174   :  { %1767 = vmatprep.subr.mxu1 %v1875_v32 }
 0x175   :  { %1768 = vmatpush3.msra.mxu1 %v1351_v3 }
 0x176   :  { %1769 = vmatprep.subr.mxu1 %v1875_v32 }
 0x177   :  { %1770 = vmatpush3.msra.mxu1 %v1350_v0 }
 0x178   :  { %1771 = vmatprep.subr.mxu1 %v1875_v32 }
 0x179   :  { %1772 = vmatpush3.msra.mxu1 %v1349_v1 }
 0x17a   :  { %1773 = vmatprep.subr.mxu1 %v1875_v32 }
 0x17b   :  { %1774 = vmatpush3.msra.mxu1 %v1348_v59 }
 0x1d0   :  { %v852_v49 = vpop.f32.mrf.mxu0 }
 0x1d1   :  { %v853_v19 = vadd.f32 %v1521_v45, %v852_v49 }
 0x1d2   :  { %v1721_v20 = vpop.f32.mrf.mxu0 }
 0x1d3   :  { %v1365_v21 = vmul.f32 %v853_v19, %v853_v19 }
 0x1d4   :  { %v855_v48 = vpop.f32.mrf.mxu0 }
 0x1d5   :  { %1366 = vadd.xlane.f32.xlu0 %v1365_v21 }
 0x1d6   :  { %v1722_v22 = vpop.f32.mrf.mxu0 }
 0x25e   :  { %v1367_v23 = vpop.xlane.xlu0 %1366 }
 0x25f   :  { %v1368_v24 = vadd.f32 1e-12, %v1367_v23 }
 0x261   :  { %1873 = vrsqrt.f32 %v1368_v24 }
 0x26e   :  { %v1874_v32 = vpop.eup %1873 }
 0x26f   :  { %v1371_v25 = vmul.f32 %v1874_v32, %v1370_v42 }
 0x271   :  { %v1372_v26 = vmul.f32 %v1371_v25, %v853_v19 }
 0x273   :  { %1776 = vmatmul.mubr.f32.vlgmr.msra.gmra.mxu1 %v1372_v26 }
 0x333   :  { %v1439_v27 = vpop.f32.mrf.mxu1 }
 0x334   :  { %1443 = vst [vmem:[%s2455_s9] sm:$0xff] %v1439_v27 }
 0x335   :  { %v1777_v28 = vpop.f32.mrf.mxu1 }

</bundles_post_ra>
